<compile_context>
chip_gen: v7x
topology: tpu7x:2x2x1
jax: 0.10.0
libtpu: 0.0.40
codegen_flags: <defaults>
</compile_context>

<pallas_src>
import jax
import jax.numpy as jnp
from jax.experimental import pallas as pl
from jax.experimental.pallas import tpu as pltpu


def _round_up(n, m):
    return ((n + m - 1) // m) * m


def _vae_kernel(x_ref, eps_ref,
                w1_ref, b1_ref,
                w2m_ref, b2m_ref, w2v_ref, b2v_ref,
                w3_ref, b3_ref, w4_ref, b4_ref,
                recon_ref, mu_ref, logvar_ref):
    """One batch tile: encoder MLP -> reparameterize -> decoder MLP."""
    # ---- encoder layer 1: bf16 operands on the MXU, f32 accumulation ----
    h = jnp.dot(x_ref[...], w1_ref[...], preferred_element_type=jnp.float32)
    h = jnp.maximum(h + b1_ref[...], 0.0)                       # ReLU (f32, VPU)

    # ---- encoder layer 2: w2/b2 pre-split into mu / logvar halves in the wrapper,
    # so there is no non-lane-aligned slicing inside the kernel ----
    mu = jnp.dot(h, w2m_ref[...], preferred_element_type=jnp.float32) + b2m_ref[...]
    logvar = jnp.dot(h, w2v_ref[...], preferred_element_type=jnp.float32) + b2v_ref[...]

    # ---- reparameterize (training mode): z = eps * exp(logvar/2) + mu  (all f32) ----
    z = eps_ref[...] * jnp.exp(logvar * 0.5) + mu

    # ---- decoder ----
    h2 = jnp.dot(z, w3_ref[...], preferred_element_type=jnp.float32)
    h2 = jnp.maximum(h2 + b3_ref[...], 0.0)                     # ReLU
    recon = jnp.dot(h2.astype(w4_ref.dtype), w4_ref[...],
                    preferred_element_type=jnp.float32) + b4_ref[...]

    recon_ref[...] = recon
    mu_ref[...] = mu
    logvar_ref[...] = logvar


def vae_forward(x_nchw, eps, params, *, batch_tile=128):
    """x_nchw: (B, C, H, W) f32; eps: (B, z_dim) f32 ~ N(0,1).
    Returns (recon_flat (B, C*H*W) f32, mu (B, z_dim) f32, logvar (B, z_dim) f32)."""
    B = x_nchw.shape[0]
    d_in = int(x_nchw.shape[1] * x_nchw.shape[2] * x_nchw.shape[3])
    z_dim = eps.shape[1]
    w1, b1, w2, b2, w3, b3, w4, b4 = params
    hid = w1.shape[1]

    # Batch tile: multiple of 8 sublanes, capped so the pipeline stays VMEM-bounded.
    tb = min(batch_tile, _round_up(B, 8))
    b_pad = _round_up(B, tb)
    grid = (b_pad // tb,)

    # Flatten NCHW row-major (== torch x.view(B, -1)) and pad batch up to the tile grid.
    x_flat = x_nchw.reshape(B, d_in)
    if b_pad != B:
        x_flat = jnp.pad(x_flat, ((0, b_pad - B), (0, 0)))
        eps = jnp.pad(eps, ((0, b_pad - B), (0, 0)))

    # bf16 operands for the two big (D_in x HID) matmuls; accumulation stays f32.
    x_bf16 = x_flat.astype(jnp.bfloat16)
    w1_bf16 = w1.astype(jnp.bfloat16)
    w4_bf16 = w4.astype(jnp.bfloat16)
    # Split the encoder head so the kernel never slices stats at a non-aligned lane offset.
    w2_mu, w2_lv = w2[:, :z_dim], w2[:, z_dim:]
    b2_mu, b2_lv = b2[:, :z_dim], b2[:, z_dim:]

    def row_spec(cols):        # per-grid-step batch tile
        return pl.BlockSpec((tb, cols), lambda i: (i, 0))

    def const_spec(shape):     # VMEM-resident across all grid steps
        return pl.BlockSpec(shape, lambda i: (0, 0))

    in_specs = [
        row_spec(d_in),                    # x tile (bf16)
        row_spec(z_dim),                   # eps tile (f32)
        const_spec((d_in, hid)),           # w1 (bf16, resident)
        const_spec((1, hid)),              # b1
        const_spec((hid, z_dim)),          # w2_mu
        const_spec((1, z_dim)),            # b2_mu
        const_spec((hid, z_dim)),          # w2_logvar
        const_spec((1, z_dim)),            # b2_logvar
        const_spec((z_dim, hid)),          # w3
        const_spec((1, hid)),              # b3
        const_spec((hid, d_in)),           # w4 (bf16, resident)
        const_spec((1, d_in)),             # b4
    ]
    out_specs = (row_spec(d_in), row_spec(z_dim), row_spec(z_dim))

    # VMEM budget: double-buffered activation tiles + resident weights + intermediate
    # headroom, sized against v7x's 64 MiB physical VMEM (tighter than v5e/v6e 128 MiB).
    tile_bytes = tb * d_in * (2 + 4) + 3 * tb * z_dim * 4         # x(bf16)+recon(f32), eps/mu/logvar
    weight_bytes = ((d_in * hid + hid * d_in) * 2                  # w1, w4 bf16
                    + (2 * hid * z_dim + z_dim * hid) * 4          # w2 halves, w3
                    + (hid + 2 * z_dim + hid + d_in) * 4)          # biases
    need = 2 * (tile_bytes + weight_bytes) + 4 * tb * (hid + d_in) * 4
    vmem_limit = int(min(max(2 * need, 8 << 20), 48 << 20))

    recon, mu, logvar = pl.pallas_call(
        _vae_kernel,
        grid=grid,
        out_shape=(
            jax.ShapeDtypeStruct((b_pad, d_in), jnp.float32),
            jax.ShapeDtypeStruct((b_pad, z_dim), jnp.float32),
            jax.ShapeDtypeStruct((b_pad, z_dim), jnp.float32),
        ),
        in_specs=in_specs,
        out_specs=out_specs,
        compiler_params=pltpu.CompilerParams(
            dimension_semantics=("parallel",),       # megacore split on v7x
            vmem_limit_bytes=vmem_limit,
        ),
    )(x_bf16, eps, w1_bf16, b1, w2_mu, b2_mu, w2_lv, b2_lv, w3, b3, w4_bf16, b4)

    # Drop batch padding.
    return recon[:B], mu[:B], logvar[:B]


def _init_linear(key, fan_in, fan_out):
    # PyTorch nn.Linear default init: U(-1/sqrt(fan_in), 1/sqrt(fan_in))
    kw, kb = jax.random.split(key)
    bound = 1.0 / jnp.sqrt(jnp.float32(fan_in))
    w = jax.random.uniform(kw, (fan_in, fan_out), jnp.float32, -bound, bound)
    b = jax.random.uniform(kb, (1, fan_out), jnp.float32, -bound, bound)
    return w, b


if __name__ == "__main__":
    # Small shapes consistent with the module: x in NCHW, z_dim latent.
    B, C, H, W = 2, 4, 16, 16
    D_IN = C * H * W          # 1024
    HID = 32                  # TODO(synk): HID=32 lights only 32 of 128/256 MXU lanes;
                              # a multiple of 128 would be needed to use the full array.
    Z_DIM = 8

    root = jax.random.PRNGKey(0)
    kx, keps, k1, k2, k3, k4 = jax.random.split(root, 6)

    x = jax.random.normal(kx, (B, C, H, W), jnp.float32)
    eps = jax.random.normal(keps, (B, Z_DIM), jnp.float32)     # N(0,1) noise for reparameterize

    # Deterministic parameter init (encoder: D_IN->HID->2*Z_DIM, decoder: Z_DIM->HID->D_IN)
    w1, b1 = _init_linear(k1, D_IN, HID)
    w2, b2 = _init_linear(k2, HID, 2 * Z_DIM)
    w3, b3 = _init_linear(k3, Z_DIM, HID)
    w4, b4 = _init_linear(k4, HID, D_IN)
    params = (w1, b1, w2, b2, w3, b3, w4, b4)

    recon, mu, logvar = vae_forward(x, eps, params)
    jax.block_until_ready((recon, mu, logvar))

    # Cross-check against a plain-JAX reference using the same bf16 operand casts
    # (f32 accumulation), so only accumulation-order noise separates the two.
    xf = x.reshape(B, D_IN)
    h_ref = jnp.maximum(
        jnp.dot(xf.astype(jnp.bfloat16), w1.astype(jnp.bfloat16),
                preferred_element_type=jnp.float32) + b1, 0.0)
    stats_ref = h_ref @ w2 + b2
    mu_ref, logvar_ref = stats_ref[:, :Z_DIM], stats_ref[:, Z_DIM:]
    z_ref = eps * jnp.exp(logvar_ref * 0.5) + mu_ref
    h2_ref = jnp.maximum(z_ref @ w3 + b3, 0.0)
    recon_ref = jnp.dot(h2_ref.astype(jnp.bfloat16), w4.astype(jnp.bfloat16),
                        preferred_element_type=jnp.float32) + b4

    assert recon.shape == (B, D_IN) and mu.shape == (B, Z_DIM) and logvar.shape == (B, Z_DIM)
    assert jnp.allclose(mu, mu_ref, atol=5e-3, rtol=5e-3)
    assert jnp.allclose(logvar, logvar_ref, atol=5e-3, rtol=5e-3)
    assert jnp.allclose(recon, recon_ref, atol=1e-2, rtol=1e-2)

    print("KERNEL_OK")
</pallas_src>

<mosaic_0001>
module attributes {stable_mosaic.version = 11 : i64} {
  func.func @_vae_kernel(%arg0: i32, %arg1: memref<8x1024xbf16, #tpu.memory_space<vmem>>, %arg2: memref<8x8xf32, #tpu.memory_space<vmem>>, %arg3: memref<1024x32xbf16, #tpu.memory_space<vmem>>, %arg4: memref<1x32xf32, #tpu.memory_space<vmem>>, %arg5: memref<32x8xf32, #tpu.memory_space<vmem>>, %arg6: memref<1x8xf32, #tpu.memory_space<vmem>>, %arg7: memref<32x8xf32, #tpu.memory_space<vmem>>, %arg8: memref<1x8xf32, #tpu.memory_space<vmem>>, %arg9: memref<8x32xf32, #tpu.memory_space<vmem>>, %arg10: memref<1x32xf32, #tpu.memory_space<vmem>>, %arg11: memref<32x1024xbf16, #tpu.memory_space<vmem>>, %arg12: memref<1x1024xf32, #tpu.memory_space<vmem>>, %arg13: memref<8x1024xf32, #tpu.memory_space<vmem>>, %arg14: memref<8x8xf32, #tpu.memory_space<vmem>>, %arg15: memref<8x8xf32, #tpu.memory_space<vmem>>) attributes {dimension_semantics = [#tpu.dimension_semantics<parallel>], iteration_bounds = array<i64: 1>, scalar_prefetch = 0 : i64, scratch_operands = 0 : i64, tpu.core_type = #tpu.core_type<tc>, window_params = [{transform_indices = @transform_0, window_bounds = array<i64: 8, 1024>}, {transform_indices = @transform_1, window_bounds = array<i64: 8, 8>}, {pipeline_mode = #tpu.pipeline_mode<synchronous>, transform_indices = @transform_2, window_bounds = array<i64: 1024, 32>}, {pipeline_mode = #tpu.pipeline_mode<synchronous>, transform_indices = @transform_3, window_bounds = array<i64: 1, 32>}, {pipeline_mode = #tpu.pipeline_mode<synchronous>, transform_indices = @transform_4, window_bounds = array<i64: 32, 8>}, {pipeline_mode = #tpu.pipeline_mode<synchronous>, transform_indices = @transform_5, window_bounds = array<i64: 1, 8>}, {pipeline_mode = #tpu.pipeline_mode<synchronous>, transform_indices = @transform_6, window_bounds = array<i64: 32, 8>}, {pipeline_mode = #tpu.pipeline_mode<synchronous>, transform_indices = @transform_7, window_bounds = array<i64: 1, 8>}, {pipeline_mode = #tpu.pipeline_mode<synchronous>, transform_indices = @transform_8, window_bounds = array<i64: 8, 32>}, {pipeline_mode = #tpu.pipeline_mode<synchronous>, transform_indices = @transform_9, window_bounds = array<i64: 1, 32>}, {pipeline_mode = #tpu.pipeline_mode<synchronous>, transform_indices = @transform_10, window_bounds = array<i64: 32, 1024>}, {pipeline_mode = #tpu.pipeline_mode<synchronous>, transform_indices = @transform_11, window_bounds = array<i64: 1, 1024>}, {transform_indices = @transform_12, window_bounds = array<i64: 8, 1024>}, {transform_indices = @transform_13, window_bounds = array<i64: 8, 8>}, {transform_indices = @transform_14, window_bounds = array<i64: 8, 8>}]} {
    %c0 = arith.constant 0 : index
    %c0_0 = arith.constant 0 : index
    %0 = vector.load %arg1[%c0, %c0_0] : memref<8x1024xbf16, #tpu.memory_space<vmem>>, vector<8x1024xbf16>
    %c0_1 = arith.constant 0 : index
    %c0_2 = arith.constant 0 : index
    %1 = vector.load %arg3[%c0_1, %c0_2] : memref<1024x32xbf16, #tpu.memory_space<vmem>>, vector<1024x32xbf16>
    %cst = arith.constant dense<0.000000e+00> : vector<8x32xf32>
    %2 = tpu.matmul %0, %1, %cst {dimension_numbers = #tpu.dot_dimension_numbers<[1], [0], [0], [1], [0, 0, 1, 1], [], []>} : vector<8x1024xbf16>, vector<1024x32xbf16>, vector<8x32xf32> -> vector<8x32xf32>
    %c0_3 = arith.constant 0 : index
    %c0_4 = arith.constant 0 : index
    %3 = vector.load %arg4[%c0_3, %c0_4] : memref<1x32xf32, #tpu.memory_space<vmem>>, vector<1x32xf32>
    %4 = vector.broadcast %3 : vector<1x32xf32> to vector<8x32xf32>
    %5 = arith.addf %2, %4 : vector<8x32xf32>
    %cst_5 = arith.constant 0.000000e+00 : f32
    %6 = vector.broadcast %cst_5 : f32 to vector<8x32xf32>
    %7 = arith.maximumf %5, %6 : vector<8x32xf32>
    %c0_6 = arith.constant 0 : index
    %c0_7 = arith.constant 0 : index
    %8 = vector.load %arg5[%c0_6, %c0_7] : memref<32x8xf32, #tpu.memory_space<vmem>>, vector<32x8xf32>
    %cst_8 = arith.constant dense<0.000000e+00> : vector<8x8xf32>
    %9 = tpu.matmul %7, %8, %cst_8 {dimension_numbers = #tpu.dot_dimension_numbers<[1], [0], [0], [1], [0, 0, 1, 1], [], []>} : vector<8x32xf32>, vector<32x8xf32>, vector<8x8xf32> -> vector<8x8xf32>
    %c0_9 = arith.constant 0 : index
    %c0_10 = arith.constant 0 : index
    %10 = vector.load %arg6[%c0_9, %c0_10] : memref<1x8xf32, #tpu.memory_space<vmem>>, vector<1x8xf32>
    %11 = vector.broadcast %10 : vector<1x8xf32> to vector<8x8xf32>
    %12 = arith.addf %9, %11 : vector<8x8xf32>
    %c0_11 = arith.constant 0 : index
    %c0_12 = arith.constant 0 : index
    %13 = vector.load %arg7[%c0_11, %c0_12] : memref<32x8xf32, #tpu.memory_space<vmem>>, vector<32x8xf32>
    %cst_13 = arith.constant dense<0.000000e+00> : vector<8x8xf32>
    %14 = tpu.matmul %7, %13, %cst_13 {dimension_numbers = #tpu.dot_dimension_numbers<[1], [0], [0], [1], [0, 0, 1, 1], [], []>} : vector<8x32xf32>, vector<32x8xf32>, vector<8x8xf32> -> vector<8x8xf32>
    %c0_14 = arith.constant 0 : index
    %c0_15 = arith.constant 0 : index
    %15 = vector.load %arg8[%c0_14, %c0_15] : memref<1x8xf32, #tpu.memory_space<vmem>>, vector<1x8xf32>
    %16 = vector.broadcast %15 : vector<1x8xf32> to vector<8x8xf32>
    %17 = arith.addf %14, %16 : vector<8x8xf32>
    %c0_16 = arith.constant 0 : index
    %c0_17 = arith.constant 0 : index
    %18 = vector.load %arg2[%c0_16, %c0_17] : memref<8x8xf32, #tpu.memory_space<vmem>>, vector<8x8xf32>
    %cst_18 = arith.constant 5.000000e-01 : f32
    %19 = vector.broadcast %cst_18 : f32 to vector<8x8xf32>
    %20 = arith.mulf %17, %19 : vector<8x8xf32>
    %21 = math.exp %20 : vector<8x8xf32>
    %22 = arith.mulf %18, %21 : vector<8x8xf32>
    %23 = arith.addf %22, %12 : vector<8x8xf32>
    %c0_19 = arith.constant 0 : index
    %c0_20 = arith.constant 0 : index
    %24 = vector.load %arg9[%c0_19, %c0_20] : memref<8x32xf32, #tpu.memory_space<vmem>>, vector<8x32xf32>
    %cst_21 = arith.constant dense<0.000000e+00> : vector<8x32xf32>
    %25 = tpu.matmul %23, %24, %cst_21 {dimension_numbers = #tpu.dot_dimension_numbers<[1], [0], [0], [1], [0, 0, 1, 1], [], []>} : vector<8x8xf32>, vector<8x32xf32>, vector<8x32xf32> -> vector<8x32xf32>
    %c0_22 = arith.constant 0 : index
    %c0_23 = arith.constant 0 : index
    %26 = vector.load %arg10[%c0_22, %c0_23] : memref<1x32xf32, #tpu.memory_space<vmem>>, vector<1x32xf32>
    %27 = vector.broadcast %26 : vector<1x32xf32> to vector<8x32xf32>
    %28 = arith.addf %25, %27 : vector<8x32xf32>
    %cst_24 = arith.constant 0.000000e+00 : f32
    %29 = vector.broadcast %cst_24 : f32 to vector<8x32xf32>
    %30 = arith.maximumf %28, %29 : vector<8x32xf32>
    %31 = arith.truncf %30 : vector<8x32xf32> to vector<8x32xbf16>
    %c0_25 = arith.constant 0 : index
    %c0_26 = arith.constant 0 : index
    %32 = vector.load %arg11[%c0_25, %c0_26] : memref<32x1024xbf16, #tpu.memory_space<vmem>>, vector<32x1024xbf16>
    %cst_27 = arith.constant dense<0.000000e+00> : vector<8x1024xf32>
    %33 = tpu.matmul %31, %32, %cst_27 {dimension_numbers = #tpu.dot_dimension_numbers<[1], [0], [0], [1], [0, 0, 1, 1], [], []>} : vector<8x32xbf16>, vector<32x1024xbf16>, vector<8x1024xf32> -> vector<8x1024xf32>
    %c0_28 = arith.constant 0 : index
    %c0_29 = arith.constant 0 : index
    %34 = vector.load %arg12[%c0_28, %c0_29] : memref<1x1024xf32, #tpu.memory_space<vmem>>, vector<1x1024xf32>
    %35 = vector.broadcast %34 : vector<1x1024xf32> to vector<8x1024xf32>
    %36 = arith.addf %33, %35 : vector<8x1024xf32>
    %c0_30 = arith.constant 0 : index
    %c0_31 = arith.constant 0 : index
    %37 = vector.load %arg13[%c0_30, %c0_31] : memref<8x1024xf32, #tpu.memory_space<vmem>>, vector<8x1024xf32>
    tpu.vector_store %arg13[%c0_30, %c0_31], %36 {strides = array<i32>} : memref<8x1024xf32, #tpu.memory_space<vmem>>, vector<8x1024xf32>,
    %c0_32 = arith.constant 0 : index
    %c0_33 = arith.constant 0 : index
    %38 = vector.load %arg14[%c0_32, %c0_33] : memref<8x8xf32, #tpu.memory_space<vmem>>, vector<8x8xf32>
    tpu.vector_store %arg14[%c0_32, %c0_33], %12 {strides = array<i32>} : memref<8x8xf32, #tpu.memory_space<vmem>>, vector<8x8xf32>,
    %c0_34 = arith.constant 0 : index
    %c0_35 = arith.constant 0 : index
    %39 = vector.load %arg15[%c0_34, %c0_35] : memref<8x8xf32, #tpu.memory_space<vmem>>, vector<8x8xf32>
    tpu.vector_store %arg15[%c0_34, %c0_35], %17 {strides = array<i32>} : memref<8x8xf32, #tpu.memory_space<vmem>>, vector<8x8xf32>,
    return
  }
  func.func @transform_0(%arg0: i32) -> (i32, i32) {
    %c0_i32 = arith.constant 0 : i32
    %c0_i32_0 = arith.constant 0 : i32
    return %arg0, %c0_i32 : i32, i32
  }
  func.func @transform_1(%arg0: i32) -> (i32, i32) {
    %c0_i32 = arith.constant 0 : i32
    %c0_i32_0 = arith.constant 0 : i32
    return %arg0, %c0_i32 : i32, i32
  }
  func.func @transform_2(%arg0: i32) -> (i32, i32) {
    %c0_i32 = arith.constant 0 : i32
    %c0_i32_0 = arith.constant 0 : i32
    %c0_i32_1 = arith.constant 0 : i32
    return %c0_i32, %c0_i32_0 : i32, i32
  }
  func.func @transform_3(%arg0: i32) -> (i32, i32) {
    %c0_i32 = arith.constant 0 : i32
    %c0_i32_0 = arith.constant 0 : i32
    %c0_i32_1 = arith.constant 0 : i32
    return %c0_i32, %c0_i32_0 : i32, i32
  }
  func.func @transform_4(%arg0: i32) -> (i32, i32) {
    %c0_i32 = arith.constant 0 : i32
    %c0_i32_0 = arith.constant 0 : i32
    %c0_i32_1 = arith.constant 0 : i32
    return %c0_i32, %c0_i32_0 : i32, i32
  }
  func.func @transform_5(%arg0: i32) -> (i32, i32) {
    %c0_i32 = arith.constant 0 : i32
    %c0_i32_0 = arith.constant 0 : i32
    %c0_i32_1 = arith.constant 0 : i32
    return %c0_i32, %c0_i32_0 : i32, i32
  }
  func.func @transform_6(%arg0: i32) -> (i32, i32) {
    %c0_i32 = arith.constant 0 : i32
    %c0_i32_0 = arith.constant 0 : i32
    %c0_i32_1 = arith.constant 0 : i32
    return %c0_i32, %c0_i32_0 : i32, i32
  }
  func.func @transform_7(%arg0: i32) -> (i32, i32) {
    %c0_i32 = arith.constant 0 : i32
    %c0_i32_0 = arith.constant 0 : i32
    %c0_i32_1 = arith.constant 0 : i32
    return %c0_i32, %c0_i32_0 : i32, i32
  }
  func.func @transform_8(%arg0: i32) -> (i32, i32) {
    %c0_i32 = arith.constant 0 : i32
    %c0_i32_0 = arith.constant 0 : i32
    %c0_i32_1 = arith.constant 0 : i32
    return %c0_i32, %c0_i32_0 : i32, i32
  }
  func.func @transform_9(%arg0: i32) -> (i32, i32) {
    %c0_i32 = arith.constant 0 : i32
    %c0_i32_0 = arith.constant 0 : i32
    %c0_i32_1 = arith.constant 0 : i32
    return %c0_i32, %c0_i32_0 : i32, i32
  }
  func.func @transform_10(%arg0: i32) -> (i32, i32) {
    %c0_i32 = arith.constant 0 : i32
    %c0_i32_0 = arith.constant 0 : i32
    %c0_i32_1 = arith.constant 0 : i32
    return %c0_i32, %c0_i32_0 : i32, i32
  }
  func.func @transform_11(%arg0: i32) -> (i32, i32) {
    %c0_i32 = arith.constant 0 : i32
    %c0_i32_0 = arith.constant 0 : i32
    %c0_i32_1 = arith.constant 0 : i32
    return %c0_i32, %c0_i32_0 : i32, i32
  }
  func.func @transform_12(%arg0: i32) -> (i32, i32) {
    %c0_i32 = arith.constant 0 : i32
    %c0_i32_0 = arith.constant 0 : i32
    return %arg0, %c0_i32 : i32, i32
  }
  func.func @transform_13(%arg0: i32) -> (i32, i32) {
    %c0_i32 = arith.constant 0 : i32
    %c0_i32_0 = arith.constant 0 : i32
    return %arg0, %c0_i32 : i32, i32
  }
  func.func @transform_14(%arg0: i32) -> (i32, i32) {
    %c0_i32 = arith.constant 0 : i32
    %c0_i32_0 = arith.constant 0 : i32
    return %arg0, %c0_i32 : i32, i32
  }
}

</mosaic_0001>

<bundles_post_ra>
// kernel: tpu_custom_call.1
= control target key start
LH: loop header
LB: loop body
LE: loop exit
PB: predicated region body
PF: predicated region fallthrough
CT: control target
= control target key end

     0   :  { %20 = vsyncpa [#allocation3], 0  ;;  %s2184_s0 = inlined_call_operand.vmem [shape: bf16[8,1024], index: 0, kind: input, shape index: {}]   ;;  %s2185_s1 = inlined_call_operand.vmem [shape: f32[8,8], index: 1, kind: input, shape index: {}]   ;;  %s2186_s2 = inlined_call_operand.vmem [shape: bf16[1024,32], index: 2, kind: input, shape index: {}]   ;;  %s2187_s3 = inlined_call_operand.vmem [shape: f32[1,32], index: 3, kind: input, shape index: {}]   ;;  %s2188_s4 = inlined_call_operand.vmem [shape: f32[32,8], index: 4, kind: input, shape index: {}]   ;;  %s2189_s5 = inlined_call_operand.vmem [shape: f32[1,8], index: 5, kind: input, shape index: {}]   ;;  %s2190_s6 = inlined_call_operand.vmem [shape: f32[32,8], index: 6, kind: input, shape index: {}]   ;;  %s2191_s7 = inlined_call_operand.vmem [shape: f32[1,8], index: 7, kind: input, shape index: {}]   ;;  %s2192_s8 = inlined_call_operand.vmem [shape: f32[8,32], index: 8, kind: input, shape index: {}]   ;;  %s2193_s9 = inlined_call_operand.vmem [shape: f32[1,32], index: 9, kind: input, shape index: {}]   ;;  %s2194_s10 = inlined_call_operand.vmem [shape: bf16[32,1024], index: 10, kind: input, shape index: {}]   ;;  %s2195_s11 = inlined_call_operand.vmem [shape: f32[1,1024], index: 11, kind: input, shape index: {}]   ;;  %s2196_s12 = inlined_call_operand.hbm [shape: f32[8,1024], index: 12, kind: output, shape index: {0}]   ;;  %s2197_s13 = inlined_call_operand.hbm [shape: f32[8,8], index: 13, kind: output, shape index: {1}]   ;;  %s2198_s14 = inlined_call_operand.hbm [shape: f32[8,8], index: 14, kind: output, shape index: {2}]  }
   0x1   :  { %v1616_v0 = vld [vmem:[%s2186_s2 + $0x40] sm:$0xff]   ;;  %v1620_v4 = vld [vmem:[%s2186_s2 + $0x48] sm:$0xff]   ;;  %v1624_v8 = vld [vmem:[%s2186_s2 + $0x50] sm:$0xff]  }
   0x2   :  { %v1617_v1 = vld [vmem:[%s2186_s2 + $0xc0] sm:$0xff]   ;;  %1470 = vmatprep.subr.bf16.mxu0 %v1616_v0  ;;  %v1621_v5 = vld [vmem:[%s2186_s2 + $0xc8] sm:$0xff]   ;;  %v1625_v9 = vld [vmem:[%s2186_s2 + $0xd0] sm:$0xff]  }
   0x3   :  { %v1618_v2 = vld [vmem:[%s2186_s2] sm:$0xff]   ;;  %1492 = vmatprep.subr.bf16.mxu1 %v1617_v1  ;;  %v1622_v6 = vld [vmem:[%s2186_s2 + $0x8] sm:$0xff]   ;;  %v1626_v10 = vld [vmem:[%s2186_s2 + $0x10] sm:$0xff]  }
   0x4   :  { %v1619_v3 = vld [vmem:[%s2186_s2 + $0x80] sm:$0xff]   ;;  %1471 = vmatpush3.bf16.msra.mxu0 %v1618_v2  ;;  %v1623_v7 = vld [vmem:[%s2186_s2 + $0x88] sm:$0xff]   ;;  %v1627_v11 = vld [vmem:[%s2186_s2 + $0x90] sm:$0xff]  }
   0x5   :  { %1493 = vmatpush3.bf16.msra.mxu1 %v1619_v3  ;;  %1472 = vmatprep.subr.bf16.mxu0 %v1620_v4  ;;  %v1628_v12 = vld [vmem:[%s2186_s2 + $0x58] sm:$0xff]   ;;  %v1632_v16 = vld [vmem:[%s2186_s2 + $0x60] sm:$0xff]   ;;  %v1636_v20 = vld [vmem:[%s2186_s2 + $0x68] sm:$0xff]  }
   0x6   :  { %1494 = vmatprep.subr.bf16.mxu1 %v1621_v5  ;;  %v1629_v13 = vld [vmem:[%s2186_s2 + $0xd8] sm:$0xff]   ;;  %v1633_v17 = vld [vmem:[%s2186_s2 + $0xe0] sm:$0xff]   ;;  %v1637_v21 = vld [vmem:[%s2186_s2 + $0xe8] sm:$0xff]  }
   0x7   :  { %v1630_v14 = vld [vmem:[%s2186_s2 + $0x18] sm:$0xff]   ;;  %v1634_v18 = vld [vmem:[%s2186_s2 + $0x20] sm:$0xff]   ;;  %v1638_v22 = vld [vmem:[%s2186_s2 + $0x28] sm:$0xff]  }
   0x8   :  { %1473 = vmatpush3.bf16.msra.mxu0 %v1622_v6  ;;  %v1631_v15 = vld [vmem:[%s2186_s2 + $0x98] sm:$0xff]   ;;  %v1635_v19 = vld [vmem:[%s2186_s2 + $0xa0] sm:$0xff]   ;;  %v1639_v23 = vld [vmem:[%s2186_s2 + $0xa8] sm:$0xff]  }
   0x9   :  { %1495 = vmatpush3.bf16.msra.mxu1 %v1623_v7  ;;  %1474 = vmatprep.subr.bf16.mxu0 %v1624_v8  ;;  %v1640_v24 = vld [vmem:[%s2186_s2 + $0x70] sm:$0xff]   ;;  %v1644_v28 = vld [vmem:[%s2186_s2 + $0x78] sm:$0xff]   ;;  %v47_v32 = vld [vmem:[%s2184_s0] sm:$0xff] }
   0xa   :  { %1496 = vmatprep.subr.bf16.mxu1 %v1625_v9  ;;  %v1641_v25 = vld [vmem:[%s2186_s2 + $0xf0] sm:$0xff]   ;;  %v1645_v29 = vld [vmem:[%s2186_s2 + $0xf8] sm:$0xff]   ;;  %v48_v33 = vld [vmem:[%s2184_s0 + $0x8] sm:$0xff]  ;;  %v1372_v34 = vcombine.low %v47_v32, %v47_v32  ;;  %v1373_v35 = vcombine.high %v47_v32, %v47_v32 }
   0xb   :  { %v1642_v26 = vld [vmem:[%s2186_s2 + $0x30] sm:$0xff]   ;;  %v1646_v30 = vld [vmem:[%s2186_s2 + $0x38] sm:$0xff]   ;;  %v1374_v36 = vcombine.low %v48_v33, %v48_v33  ;;  %v1375_v37 = vcombine.high %v48_v33, %v48_v33  ;;  %v1652_v38 = vld [vmem:[%s2186_s2 + $0x140] sm:$0xff]  }
   0xc   :  { %1475 = vmatpush3.bf16.msra.mxu0 %v1626_v10  ;;  %v1643_v27 = vld [vmem:[%s2186_s2 + $0xb0] sm:$0xff]   ;;  %v1647_v31 = vld [vmem:[%s2186_s2 + $0xb8] sm:$0xff]   ;;  %v1653_v39 = vld [vmem:[%s2186_s2 + $0x1c0] sm:$0xff]   ;;  %630 = vmatprep.mubr.bf16.mxu0 %v1373_v35 }
   0xd   :  { %1497 = vmatpush3.bf16.msra.mxu1 %v1627_v11  ;;  %1476 = vmatprep.subr.bf16.mxu0 %v1628_v12  ;;  %v1654_v40 = vld [vmem:[%s2186_s2 + $0x100] sm:$0xff]   ;;  %v1656_v42 = vld [vmem:[%s2186_s2 + $0x148] sm:$0xff]   ;;  %v1660_v46 = vld [vmem:[%s2186_s2 + $0x150] sm:$0xff]  }
   0xe   :  { %1498 = vmatprep.subr.bf16.mxu1 %v1629_v13  ;;  %670 = vmatprep.mubr.bf16.mxu1 %v1375_v37  ;;  %v1655_v41 = vld [vmem:[%s2186_s2 + $0x180] sm:$0xff]   ;;  %v1657_v43 = vld [vmem:[%s2186_s2 + $0x1c8] sm:$0xff]   ;;  %v1661_v47 = vld [vmem:[%s2186_s2 + $0x1d0] sm:$0xff]  }
   0xf   :  { %v1658_v44 = vld [vmem:[%s2186_s2 + $0x108] sm:$0xff]   ;;  %v1662_v48 = vld [vmem:[%s2186_s2 + $0x110] sm:$0xff]   ;;  %v1664_v50 = vld [vmem:[%s2186_s2 + $0x158] sm:$0xff]  }
  0x10   :  { %1477 = vmatpush3.bf16.msra.mxu0 %v1630_v14  ;;  %v1659_v45 = vld [vmem:[%s2186_s2 + $0x188] sm:$0xff]   ;;  %v1663_v49 = vld [vmem:[%s2186_s2 + $0x190] sm:$0xff]   ;;  %v1665_v51 = vld [vmem:[%s2186_s2 + $0x1d8] sm:$0xff]  }
  0x11   :  { %1499 = vmatpush3.bf16.msra.mxu1 %v1631_v15  ;;  %1478 = vmatprep.subr.bf16.mxu0 %v1632_v16  ;;  %v1666_v52 = vld [vmem:[%s2186_s2 + $0x118] sm:$0xff]   ;;  %v1668_v54 = vld [vmem:[%s2186_s2 + $0x160] sm:$0xff]   ;;  %v1672_v58 = vld [vmem:[%s2186_s2 + $0x168] sm:$0xff]  }
  0x12   :  { %1500 = vmatprep.subr.bf16.mxu1 %v1633_v17  ;;  %v1667_v53 = vld [vmem:[%s2186_s2 + $0x198] sm:$0xff]   ;;  %v1669_v55 = vld [vmem:[%s2186_s2 + $0x1e0] sm:$0xff]   ;;  %v1673_v59 = vld [vmem:[%s2186_s2 + $0x1e8] sm:$0xff]  }
  0x13   :  { %v1670_v56 = vld [vmem:[%s2186_s2 + $0x120] sm:$0xff]   ;;  %v1674_v60 = vld [vmem:[%s2186_s2 + $0x128] sm:$0xff]   ;;  %v1676_v62 = vld [vmem:[%s2186_s2 + $0x170] sm:$0xff]  }
  0x14   :  { %1479 = vmatpush3.bf16.msra.mxu0 %v1634_v18  ;;  %v1671_v57 = vld [vmem:[%s2186_s2 + $0x1a0] sm:$0xff]   ;;  %v1675_v61 = vld [vmem:[%s2186_s2 + $0x1a8] sm:$0xff]   ;;  %v1677_v63 = vld [vmem:[%s2186_s2 + $0x1f0] sm:$0xff]  }
  0x15   :  { %1501 = vmatpush3.bf16.msra.mxu1 %v1635_v19  ;;  %1480 = vmatprep.subr.bf16.mxu0 %v1636_v20  ;;  %v1678_v0 = vld [vmem:[%s2186_s2 + $0x130] sm:$0xff]   ;;  %v1680_v2 = vld [vmem:[%s2186_s2 + $0x178] sm:$0xff]  }
  0x16   :  { %1502 = vmatprep.subr.bf16.mxu1 %v1637_v21  ;;  %v1679_v1 = vld [vmem:[%s2186_s2 + $0x1b0] sm:$0xff]   ;;  %v1681_v3 = vld [vmem:[%s2186_s2 + $0x1f8] sm:$0xff]  }
  0x17   :  { %v1682_v4 = vld [vmem:[%s2186_s2 + $0x138] sm:$0xff]   ;;  %v49_v6 = vld [vmem:[%s2184_s0 + $0x10] sm:$0xff] }
  0x18   :  { %1481 = vmatpush3.bf16.msra.mxu0 %v1638_v22  ;;  %v1683_v5 = vld [vmem:[%s2186_s2 + $0x1b8] sm:$0xff]   ;;  %v1376_v7 = vcombine.low %v49_v6, %v49_v6  ;;  %v1377_v8 = vcombine.high %v49_v6, %v49_v6 }
  0x19   :  { %1503 = vmatpush3.bf16.msra.mxu1 %v1639_v23  ;;  %1482 = vmatprep.subr.bf16.mxu0 %v1640_v24  ;;  %v50_v9 = vld [vmem:[%s2184_s0 + $0x18] sm:$0xff] }
  0x1a   :  { %1504 = vmatprep.subr.bf16.mxu1 %v1641_v25 }
  0x1c   :  { %1483 = vmatpush3.bf16.msra.mxu0 %v1642_v26 }
  0x1d   :  { %1505 = vmatpush3.bf16.msra.mxu1 %v1643_v27  ;;  %1484 = vmatprep.subr.bf16.mxu0 %v1644_v28 }
  0x1e   :  { %1506 = vmatprep.subr.bf16.mxu1 %v1645_v29 }
  0x20   :  { %1485 = vmatpush3.bf16.msra.mxu0 %v1646_v30 }
  0x21   :  { %1507 = vmatpush3.bf16.msra.mxu1 %v1647_v31  ;;  %1514 = vmatprep.subr.bf16.mxu0 %v1652_v38 }
  0x22   :  { %1536 = vmatprep.subr.bf16.mxu1 %v1653_v39 }
  0x23   :  { %631 = vmatmul.mubr.bf16.vlgmr.msra.gmra.mrb[0].mxu0 %v1372_v34 }
  0x24   :  { %671 = vmatmul.mubr.bf16.vlgmr.msra.gmra.mrb[0].mxu1 %v1374_v36  ;;  %1515 = vmatpush3.bf16.msra.mxu0 %v1654_v40 }
  0x25   :  { %1537 = vmatpush3.bf16.msra.mxu1 %v1655_v41  ;;  %1516 = vmatprep.subr.bf16.mxu0 %v1656_v42 }
  0x26   :  { %1538 = vmatprep.subr.bf16.mxu1 %v1657_v43 }
  0x28   :  { %1517 = vmatpush3.bf16.msra.mxu0 %v1658_v44 }
  0x29   :  { %1539 = vmatpush3.bf16.msra.mxu1 %v1659_v45  ;;  %1518 = vmatprep.subr.bf16.mxu0 %v1660_v46 }
  0x2a   :  { %1540 = vmatprep.subr.bf16.mxu1 %v1661_v47 }
  0x2c   :  { %1519 = vmatpush3.bf16.msra.mxu0 %v1662_v48 }
  0x2d   :  { %1541 = vmatpush3.bf16.msra.mxu1 %v1663_v49  ;;  %1520 = vmatprep.subr.bf16.mxu0 %v1664_v50 }
  0x2e   :  { %1542 = vmatprep.subr.bf16.mxu1 %v1665_v51 }
  0x30   :  { %1521 = vmatpush3.bf16.msra.mxu0 %v1666_v52 }
  0x31   :  { %1543 = vmatpush3.bf16.msra.mxu1 %v1667_v53  ;;  %1522 = vmatprep.subr.bf16.mxu0 %v1668_v54 }
  0x32   :  { %1544 = vmatprep.subr.bf16.mxu1 %v1669_v55 }
  0x34   :  { %1523 = vmatpush3.bf16.msra.mxu0 %v1670_v56 }
  0x35   :  { %1545 = vmatpush3.bf16.msra.mxu1 %v1671_v57  ;;  %1524 = vmatprep.subr.bf16.mxu0 %v1672_v58 }
  0x36   :  { %1546 = vmatprep.subr.bf16.mxu1 %v1673_v59 }
  0x38   :  { %1525 = vmatpush3.bf16.msra.mxu0 %v1674_v60 }
  0x39   :  { %1547 = vmatpush3.bf16.msra.mxu1 %v1675_v61  ;;  %1526 = vmatprep.subr.bf16.mxu0 %v1676_v62 }
  0x3a   :  { %1548 = vmatprep.subr.bf16.mxu1 %v1677_v63 }
  0x3c   :  { %1527 = vmatpush3.bf16.msra.mxu0 %v1678_v0 }
  0x3d   :  { %1549 = vmatpush3.bf16.msra.mxu1 %v1679_v1  ;;  %1528 = vmatprep.subr.bf16.mxu0 %v1680_v2 }
  0x3e   :  { %1550 = vmatprep.subr.bf16.mxu1 %v1681_v3 }
  0x3f   :  { %21 = vsyncpa [#allocation5], 0  ;;  %v1378_v10 = vcombine.low %v50_v9, %v50_v9  ;;  %v1379_v11 = vcombine.high %v50_v9, %v50_v9  ;;  %710 = vmatprep.mubr.bf16.mxu0 %v1377_v8  ;;  %v844_v12 = vld [vmem:[%s2190_s6] sm:$0xff]  ;;  %v845_v13 = vld [vmem:[%s2190_s6 + $0x8] sm:$0xff]  ;;  %v1760_v17 = vmov 0.0|0.0   ;;  %vm1761_vm0 = vmmov 0  }
  0x40   :  { %1529 = vmatpush3.bf16.msra.mxu0 %v1682_v4  ;;  %v759_v14 = vld [vmem:[%s2188_s4] sm:$0xff]  ;;  %v1604_v15 = vpack.c.bf16 %v845_v13, %v844_v12  ;;  %v760_v16 = vld [vmem:[%s2188_s4 + $0x8] sm:$0xff]  ;;  %v846_v19 = vld [vmem:[%s2190_s6 + $0x10] sm:$0xff]  ;;  %v1762_v25 = vmov 0.0   ;;  %vm770_vm1 = vcmask 261120   ;;  %vm939_vm2 = vcmask 64512  }
  0x41   :  { %1551 = vmatpush3.bf16.msra.mxu1 %v1683_v5  ;;  %750 = vmatprep.mubr.bf16.mxu1 %v1379_v11  ;;  %v1598_v18 = vpack.c.bf16 %v760_v16, %v759_v14  ;;  %v847_v20 = vld [vmem:[%s2190_s6 + $0x18] sm:$0xff]  ;;  %v761_v21 = vld [vmem:[%s2188_s4 + $0x10] sm:$0xff]  ;;  %v1371_v28 = vld [vmem:[%s2187_s3] ss:$0 sm:$0xff] }
  0x42   :  { %1603 = vmatprep.subr.bf16.mxu1 %v1760_v17  ;;  %1597 = vmatprep.subr.bf16.mxu0 %v1760_v17  ;;  %v1607_v22 = vpack.c.bf16 %v847_v20, %v846_v19  ;;  %v762_v23 = vld [vmem:[%s2188_s4 + $0x18] sm:$0xff]  ;;  %v931_v52 = vld [vmem:[%s2192_s8] sm:$0xff]  ;;  %v1016_v55 = vld [vmem:[%s2194_s10 + $0x8] sm:$0xff] }
  0x43   :  { %711 = vmatmul.mubr.bf16.vlgmr.msra.gmra.mrb[4].mxu0 %v1376_v7  ;;  %v1601_v24 = vpack.c.bf16 %v762_v23, %v761_v21  ;;  %v1015_v53 = vld [vmem:[%s2194_s10] sm:$0xff]  ;;  %v1020_v58 = vld [vmem:[%s2194_s10 + $0x28] sm:$0xff]  ;;  %v1017_v19 = vld [vmem:[%s2194_s10 + $0x10] sm:$0xff] }
  0x44   :  { %751 = vmatmul.mubr.bf16.vlgmr.msra.gmra.mrb[4].mxu1 %v1378_v10  ;;  %1599 = vmatpush3.bf16.msra.mxu0 %v1598_v18  ;;  %v1019_v54 = vld [vmem:[%s2194_s10 + $0x20] sm:$0xff]  ;;  %v1452_v59 = vcombine.low %v1016_v55, %v1020_v58  ;;  %v1453_v60 = vcombine.high %v1016_v55, %v1020_v58  ;;  %v1024_v13 = vld [vmem:[%s2194_s10 + $0x48] sm:$0xff]  ;;  %v1021_v20 = vld [vmem:[%s2194_s10 + $0x30] sm:$0xff] }
  0x45   :  { %1605 = vmatpush3.bf16.msra.mxu1 %v1604_v15  ;;  %1600 = vmatprep.subr.bf16.mxu0 %v1760_v17  ;;  %v1450_v56 = vcombine.low %v1015_v53, %v1019_v54  ;;  %v1451_v57 = vcombine.high %v1015_v53, %v1019_v54  ;;  %v1444_v61 = vld [vmem:[%s2189_s5] ss:$0 sm:$0xff]  ;;  %v1028_v15 = vld [vmem:[%s2194_s10 + $0x68] sm:$0xff]  ;;  %v1018_v21 = vld [vmem:[%s2194_s10 + $0x18] sm:$0xff]  ;;  %v1455_v23 = vcombine.high %v1017_v19, %v1021_v20 }
  0x46   :  { %1606 = vmatprep.subr.bf16.mxu1 %v1760_v17  ;;  %1578 = vmatprep.mubr.msk.f32.mxu0 %vm1761_vm0, %v1762_v25  ;;  %v1446_v62 = vld [vmem:[%s2191_s7] ss:$0 sm:$0xff]  ;;  %v1460_v17 = vcombine.low %v1024_v13, %v1028_v15  ;;  %v1461_v18 = vcombine.high %v1024_v13, %v1028_v15 }
  0x47   :  { %1589 = vmatprep.mubr.msk.f32.mxu1 %vm1761_vm0, %v1762_v25  ;;  %v925_v7 = vld [vmem:[%s2185_s1] sm:$0xff] }
  0x48   :  { %1602 = vmatpush3.bf16.msra.mxu0 %v1601_v24  ;;  %v1023_v11 = vld [vmem:[%s2194_s10 + $0x40] sm:$0xff]  ;;  %v1022_v24 = vld [vmem:[%s2194_s10 + $0x38] sm:$0xff] }
  0x49   :  { %1608 = vmatpush3.bf16.msra.mxu1 %v1607_v22  ;;  %1592 = vmatprep.subr.mxu0 %v1762_v25  ;;  %v1027_v12 = vld [vmem:[%s2194_s10 + $0x60] sm:$0xff]  ;;  %v1454_v22 = vcombine.low %v1017_v19, %v1021_v20 }
  0x4a   :  { %1156 = vmatprep.subr.bf16.mxu1 %v1451_v57  ;;  %v1459_v14 = vcombine.high %v1023_v11, %v1027_v12  ;;  %v1458_v16 = vcombine.low %v1023_v11, %v1027_v12 }
  0xf6   :  { %v1486_v26 = vpop.f32.mrb[0].mxu0 }
  0xf7   :  { %v1508_v27 = vpop.f32.mrb[0].mxu1  ;;  %v1487_v29 = vpop.f32.mrb[1].mxu0 }
  0xf8   :  { %v1509_v30 = vpop.f32.mrb[1].mxu1  ;;  %v1488_v31 = vadd.f32 %v1487_v29, %v1486_v26  ;;  %v1489_v33 = vpop.f32.mrb[2].mxu0  ;;  %v1456_v26 = vcombine.low %v1018_v21, %v1022_v24 }
  0xf9   :  { %v1510_v32 = vadd.f32 %v1509_v30, %v1508_v27  ;;  %v1511_v34 = vpop.f32.mrb[2].mxu1  ;;  %v1490_v35 = vpop.f32.mrb[3].mxu0  ;;  %v1457_v27 = vcombine.high %v1018_v21, %v1022_v24  ;;  %v1029_v33 = vld [vmem:[%s2194_s10 + $0x70] sm:$0xff] }
  0xfa   :  { %v1512_v36 = vpop.f32.mrb[3].mxu1  ;;  %v633_v37 = vadd.f32 %v1488_v31, %v1371_v28  ;;  %v1448_v28 = vld [vmem:[%s2193_s9] ss:$0 sm:$0xff]  ;;  %v1026_v34 = vld [vmem:[%s2194_s10 + $0x58] sm:$0xff]  ;;  %s1764_s9 = smov [#allocation4]  }
  0xfb   :  { %v1030_v35 = vld [vmem:[%s2194_s10 + $0x78] sm:$0xff] }
  0xfc   :  { %v673_v38 = vadd.f32 %v1510_v32, %v633_v37  ;;  %v1025_v32 = vld [vmem:[%s2194_s10 + $0x50] sm:$0xff]  ;;  %s1346_s10 = sshll.u32 %s1764_s9, 4  ;;  %s1347_s10 = int_to_ptr.vmem [resolvable:$true] %s1346_s10 }
  0xfd   :  { %s1690_s7 = scalar_lea.vmem %s1347_s10, 128  ;;  %p1695_p1 = scmp.lt.s32.totalorder %s1347_s10, %s1347_s10 }
  0xfe   :  { %p1691_p0 = scmp.ne.s32.totalorder %s1347_s10, %s1690_s7  ;;  %p1696_p2 = scmp.lt.s32.totalorder %s1690_s7, %s1690_s7 }
 0x100   :  { %p1697_p3 = por %p1696_p2, %p1695_p1 }
 0x102   :  { %p1698_p4 = pnand %p1697_p3, %p1691_p0 }
 0x116   :  { %v1530_v39 = vpop.f32.mrb[4].mxu0 }
 0x117   :  { %v1552_v40 = vpop.f32.mrb[4].mxu1  ;;  %v1531_v41 = vpop.f32.mrb[5].mxu0 }
 0x118   :  { %v1553_v42 = vpop.f32.mrb[5].mxu1  ;;  %v1532_v43 = vadd.f32 %v1531_v41, %v1530_v39  ;;  %v1533_v45 = vpop.f32.mrb[6].mxu0  ;;  %v1465_v39 = vcombine.high %v1026_v34, %v1030_v35  ;;  %v1464_v41 = vcombine.low %v1026_v34, %v1030_v35 }
 0x119   :  { %v1554_v44 = vadd.f32 %v1553_v42, %v1552_v40  ;;  %v1555_v46 = vpop.f32.mrb[6].mxu1  ;;  %v1534_v47 = vpop.f32.mrb[7].mxu0  ;;  %v1462_v40 = vcombine.low %v1025_v32, %v1029_v33 }
 0x11a   :  { %v1556_v48 = vpop.f32.mrb[7].mxu1  ;;  %v713_v49 = vadd.f32 %v1532_v43, %v673_v38  ;;  %v1463_v38 = vcombine.high %v1025_v32, %v1029_v33 }
 0x11c   :  { %v753_v50 = vadd.f32 %v1554_v44, %v713_v49 }
 0x11e   :  { %v758_v51 = vmax.f32 %v753_v50, 0.0 }
 0x120   :  { %1579 = vmatmul.mubr.msk.f32.vlgmr.msra.gmra.mrb[8].mxu0 %vm770_vm1, %v758_v51  ;;  %1590 = vmatmul.mubr.msk.f32.vlgmr.msra.gmra.mrb[8].mxu1 %vm770_vm1, %v758_v51 }
 0x121   :  { %1594 = vmatprep.mubr.msk.f32.mxu0 %vm1761_vm0, %v1762_v25  ;;  %1593 = vmatpush3.msra.mxu0 %v931_v52  ;;  %v1763_v25 = vmov 0  }
 0x122   :  { %1197 = vmatprep.subr.bf16.mxu0 %v1453_v60  ;;  %1157 = vmatpush1.bf16.msra.mxu1 %v1450_v56 }
 0x123   :  { %1158 = vmatprep.subr.bf16.mxu1 %v1459_v14  ;;  %1188 = vmatprep.mubr.bf16.mxu1 %v1763_v25 }
 0x126   :  { %1159 = vmatpush1.bf16.msra.mxu1 %v1458_v16 }
 0x127   :  { %1238 = vmatprep.subr.bf16.mxu1 %v1455_v23 }
 0x1f3   :  { %v840_v63 = vpop.f32.mrb[8].mxu0  ;;  %v921_v0 = vpop.f32.mrb[8].mxu1 }
 0x1f4   :  { %v841_v1 = vadd.f32 %v1444_v61, %v840_v63  ;;  %v922_v2 = vadd.f32 %v1446_v62, %v921_v0  ;;  %v1580_v3 = vpop.f32.mrb[9].mxu0  ;;  %v1591_v4 = vpop.f32.mrb[9].mxu1 }
 0x1f6   :  { %v926_v5 = vmul.f32 0.5, %v922_v2  ;;  %1328 = vst.msk [vmem:[#allocation4] sm:$0xff] %vm939_vm2, %v841_v1  ;;  %1329 = vst.msk [vmem:[#allocation6] sm:$0xff] %vm939_vm2, %v922_v2 }
 0x1f8   :  { %v927_v6 = vmul.f32 1.442695, %v926_v5 }
 0x1fa   :  { %1688 = vpow2.f32 %v927_v6 }
 0x204   :  { %v1689_v8 = vpop.eup %1688 }
 0x205   :  { %v929_v9 = vmul.f32 %v1689_v8, %v925_v7 }
 0x207   :  { %v930_v10 = vadd.f32 %v929_v9, %v841_v1 }
 0x209   :  { %1595 = vmatmul.mubr.msk.f32.vlgmr.msra.gmra.mrb[10].mxu0 %vm939_vm2, %v930_v10 }
 0x20a   :  { %1198 = vmatpush1.bf16.msra.mxu0 %v1452_v59  ;;  %1229 = vmatprep.mubr.bf16.mxu0 %v1763_v25 }
 0x20b   :  { %1199 = vmatprep.subr.bf16.mxu0 %v1461_v18 }
 0x20e   :  { %1200 = vmatpush1.bf16.msra.mxu0 %v1460_v17 }
 0x20f   :  { %1279 = vmatprep.subr.bf16.mxu0 %v1457_v27 }
 0x2dc   :  { %v1009_v29 = vpop.f32.mrb[10].mxu0 }
 0x2dd   :  { %v1010_v30 = vadd.f32 %v1448_v28, %v1009_v29  ;;  %v1596_v31 = vpop.f32.mrb[11].mxu0 }
 0x2df   :  { %v1013_v36 = vmax.f32 %v1010_v30, 0.0 }
 0x2e1   :  { %v1014_v37 = vpack.c.bf16 %v1013_v36, %v1013_v36 }
 0x2e3   :  { %1466 = vmatmul.mubr.msk.bf16.vlgmr.msra.gmra.mrb[12].mxu1 %vm770_vm1, %v1014_v37  ;;  %1467 = vmatmul.mubr.msk.bf16.vlgmr.msra.gmra.mrb[12].mxu0 %vm770_vm1, %v1014_v37 }
 0x2e4   :  { %1239 = vmatpush1.bf16.msra.mxu1 %v1454_v22  ;;  %1280 = vmatpush1.bf16.msra.mxu0 %v1456_v26 }
 0x2e5   :  { %1240 = vmatprep.subr.bf16.mxu1 %v1463_v38  ;;  %1281 = vmatprep.subr.bf16.mxu0 %v1465_v39 }
 0x2e6   :  { %1270 = vmatprep.mubr.bf16.mxu1 %v1763_v25  ;;  %1311 = vmatprep.mubr.bf16.mxu0 %v1763_v25 }
 0x2e8   :  { %1241 = vmatpush1.bf16.msra.mxu1 %v1462_v40  ;;  %1282 = vmatpush1.bf16.msra.mxu0 %v1464_v41 }
 0x2eb   :  { %1468 = vmatmul.mubr.msk.bf16.vlgmr.msra.gmra.mrb[16].mxu1 %vm770_vm1, %v1014_v37  ;;  %1469 = vmatmul.mubr.msk.bf16.vlgmr.msra.gmra.mrb[16].mxu0 %vm770_vm1, %v1014_v37 }
 0x2ec   :  { %1701 = shalt.err (!%p1698_p4)
}
 0x2ed   :  { %s1702_s17 = scalar_lea.hbm %s2197_s13, 128 }
 0x2ee   :  { %p1703_p5 = scmp.ne.s32.totalorder %s2197_s13, %s1702_s17  ;;  %p1706_p6 = scmp.lt.u32.totalorder %s1702_s17, %s2197_s13 }
 0x2f0   :  { %p1708_p7 = pnand %p1706_p6, %p1703_p5 }
 0x2f2   :  { %1711 = shalt.err (!%p1708_p7)
}
 0x2f3   :  { %1349 = dma.vmem_to_hbm [thread:$0]  %s1347_s10, 128, %s2197_s13, [#allocation5]  }
 0x2f4   :  { %s1765_s20 = smov [#allocation6]  }
 0x2f5   :  { %s1356_s2 = sshll.u32 %s1765_s20, 4  ;;  %s1357_s2 = int_to_ptr.vmem [resolvable:$true] %s1356_s2 }
 0x2f6   :  { %s1712_s21 = scalar_lea.vmem %s1357_s2, 128  ;;  %p1717_p9 = scmp.lt.s32.totalorder %s1357_s2, %s1357_s2 }
 0x2f7   :  { %p1713_p8 = scmp.ne.s32.totalorder %s1357_s2, %s1712_s21  ;;  %p1718_p10 = scmp.lt.s32.totalorder %s1712_s21, %s1712_s21 }
 0x2f9   :  { %p1719_p11 = por %p1718_p10, %p1717_p9 }
 0x2fb   :  { %p1720_p12 = pnand %p1719_p11, %p1713_p8 }
 0x2fd   :  { %1723 = shalt.err (!%p1720_p12)
}
 0x2fe   :  { %s1724_s24 = scalar_lea.hbm %s2198_s14, 128 }
 0x2ff   :  { %p1725_p13 = scmp.ne.s32.totalorder %s2198_s14, %s1724_s24  ;;  %p1728_p0 = scmp.lt.u32.totalorder %s1724_s24, %s2198_s14 }
 0x301   :  { %p1730_p1 = pnand %p1728_p0, %p1725_p13 }
 0x303   :  { %1733 = shalt.err (!%p1730_p1)
}
 0x304   :  { %1359 = dma.vmem_to_hbm [thread:$0]  %s1357_s2, 128, %s2198_s14, [#allocation5]   ;;  %v1033_v42 = vlaneseq  ;;  %v1031_v46 = vld [vmem:[%s2195_s11] sm:$0xff] }
 0x305   :  { %s1766_s11 = smov [#allocation2]  }
 0x306   :  { %v1034_v43 = vshrl.u32 %v1033_v42, 7  ;;  %s1336_s14 = sshll.u32 %s1766_s11, 4  ;;  %s1337_s14 = int_to_ptr.vmem [resolvable:$true] %s1336_s14 }
 0x307   :  { %s1734_s30 = scalar_lea.vmem %s1337_s14, 1024  ;;  %p1739_p3 = scmp.lt.s32.totalorder %s1337_s14, %s1337_s14 }
 0x308   :  { %v1035_v44 = vsub.s32 0, %v1034_v43  ;;  %v1043_v45 = vsub.s32 2, %v1034_v43  ;;  %v1039_v47 = vsub.s32 1, %v1034_v43  ;;  %v1047_v48 = vsub.s32 3, %v1034_v43  ;;  %p1735_p2 = scmp.ne.s32.totalorder %s1337_s14, %s1734_s30  ;;  %p1740_p4 = scmp.lt.s32.totalorder %s1734_s30, %s1734_s30 }
 0x309   :  { %v1051_v59 = vsub.s32 4, %v1034_v43  ;;  %v1059_v60 = vsub.s32 6, %v1034_v43  ;;  %v1055_v1 = vsub.s32 5, %v1034_v43  ;;  %v1063_v2 = vsub.s32 7, %v1034_v43 }
 0x30a   :  { %v1036_v49 = vrot.slane %v1031_v46, %v1035_v44  ;;  %v1044_v50 = vrot.slane %v1031_v46, %v1043_v45  ;;  %v1040_v51 = vrot.slane %v1031_v46, %v1039_v47  ;;  %v1048_v52 = vrot.slane %v1031_v46, %v1047_v48  ;;  %p1741_p5 = por %p1740_p4, %p1739_p3 }
 0x30b   :  { %v1052_v5 = vrot.slane %v1031_v46, %v1051_v59  ;;  %v1060_v6 = vrot.slane %v1031_v46, %v1059_v60  ;;  %v1056_v7 = vrot.slane %v1031_v46, %v1055_v1  ;;  %v1064_v8 = vrot.slane %v1031_v46, %v1063_v2 }
 0x30c   :  { %p1742_p6 = pnand %p1741_p5, %p1735_p2 }
 0x3b6   :  { %v1190_v53 = vpop.f32.mrb[12].mxu1  ;;  %v1231_v54 = vpop.f32.mrb[12].mxu0 }
 0x3b7   :  { %v1191_v55 = vadd.f32 %v1190_v53, %v1036_v49  ;;  %v1232_v56 = vadd.f32 %v1231_v54, %v1044_v50  ;;  %v1192_v57 = vpop.f32.mrb[13].mxu1  ;;  %v1233_v58 = vpop.f32.mrb[13].mxu0 }
 0x3b8   :  { %v1193_v61 = vadd.f32 %v1192_v57, %v1040_v51  ;;  %v1234_v62 = vadd.f32 %v1233_v58, %v1048_v52  ;;  %v1194_v63 = vpop.f32.mrb[14].mxu1  ;;  %v1235_v0 = vpop.f32.mrb[14].mxu0 }
 0x3b9   :  { %1320 = vst [vmem:[#allocation2] sm:$0xff] %v1191_v55  ;;  %1322 = vst [vmem:[#allocation2 + $0x10] sm:$0xff] %v1232_v56  ;;  %v1195_v3 = vpop.f32.mrb[15].mxu1  ;;  %v1236_v4 = vpop.f32.mrb[15].mxu0 }
 0x3ba   :  { %1321 = vst [vmem:[#allocation2 + $0x8] sm:$0xff] %v1193_v61  ;;  %1323 = vst [vmem:[#allocation2 + $0x18] sm:$0xff] %v1234_v62 }
 0x3be   :  { %v1272_v9 = vpop.f32.mrb[16].mxu1  ;;  %v1313_v10 = vpop.f32.mrb[16].mxu0 }
 0x3bf   :  { %v1273_v11 = vadd.f32 %v1272_v9, %v1052_v5  ;;  %v1314_v12 = vadd.f32 %v1313_v10, %v1060_v6  ;;  %v1274_v13 = vpop.f32.mrb[17].mxu1  ;;  %v1315_v14 = vpop.f32.mrb[17].mxu0 }
 0x3c0   :  { %v1275_v15 = vadd.f32 %v1274_v13, %v1056_v7  ;;  %v1316_v16 = vadd.f32 %v1315_v14, %v1064_v8  ;;  %v1276_v17 = vpop.f32.mrb[18].mxu1  ;;  %v1317_v18 = vpop.f32.mrb[18].mxu0 }
 0x3c1   :  { %1324 = vst [vmem:[#allocation2 + $0x20] sm:$0xff] %v1273_v11  ;;  %1326 = vst [vmem:[#allocation2 + $0x30] sm:$0xff] %v1314_v12  ;;  %v1277_v19 = vpop.f32.mrb[19].mxu1  ;;  %v1318_v20 = vpop.f32.mrb[19].mxu0 }
 0x3c2   :  { %1325 = vst [vmem:[#allocation2 + $0x28] sm:$0xff] %v1275_v15  ;;  %1327 = vst [vmem:[#allocation2 + $0x38] sm:$0xff] %v1316_v16 }
 0x3c3   :  { %1745 = shalt.err (!%p1742_p6)
}
 0x3c4   :  { %s1746_s10 = scalar_lea.hbm %s2196_s12, 1024 }
 0x3c5   :  { %p1747_p7 = scmp.ne.s32.totalorder %s2196_s12, %s1746_s10  ;;  %p1750_p8 = scmp.lt.u32.totalorder %s1746_s10, %s2196_s12 }
 0x3c7   :  { %p1752_p9 = pnand %p1750_p8, %p1747_p7 }
 0x3c9   :  { %1755 = shalt.err (!%p1752_p9)
}
 0x3ca   :  { %1339 = dma.vmem_to_hbm [thread:$0]  %s1337_s14, 1024, %s2196_s12, [#allocation3]  }
 0x3cb   :  { %1756 = dma.done.wait [#allocation3], 1024  }
 0x3cc   :  { %1757 = vsyncadd [#allocation3], 4294966272 }
 0x3cd   :  { %1758 = dma.done.wait [#allocation5], 256  }
 0x3ce   :  { %1759 = vsyncadd [#allocation5], 4294967040 }
 0x3cf   :  { %1369 = vsyncpa [#allocation3], 1 }
 0x3d0   :  { %1370 = vsyncpa [#allocation5], 1 }

</bundles_post_ra>
